<compile_context>
chip_gen: v7x
topology: tpu7x:2x2x1
jax: 0.10.0
libtpu: 0.0.40
codegen_flags: <defaults>
</compile_context>

<pallas_src>
import jax
import jax.numpy as jnp
from jax.experimental import pallas as pl
from jax.experimental.pallas import tpu as pltpu


def _scorers_kernel(x_ref, wsel_ref, bias_ref, mask_ref, out_ref):
    # x_ref:    (TB, N*D)  lane-dense bf16 embedding slab for this batch tile
    # wsel_ref: (N*D, N)   block-diagonal scorer weights, bf16 (resident)
    # bias_ref: (1, N)     scorer biases, f32 (resident)
    # mask_ref: (TB, N)    f32
    # out_ref:  (TB, 1)    f32
    #
    # Native bf16 operands straight into the MXU, f32 accumulation.
    scores = jnp.dot(x_ref[...], wsel_ref[...],
                     preferred_element_type=jnp.float32)          # (TB, N) f32
    scores = scores + bias_ref[...]                               # (1, N) broadcast

    prob = jax.nn.sigmoid(scores)                                 # EUP
    m = mask_ref[...]
    prob = prob * m

    num = jnp.sum(prob, axis=-1, keepdims=True)                   # (TB, 1)
    den = jnp.sum(m, axis=-1, keepdims=True)                      # (TB, 1)
    # Masked mean; divide on the EUP (approx reciprocal), not the VPU.
    out_ref[...] = (num * pl.reciprocal(den, approx=True)).astype(out_ref.dtype)


def make_scorer_params(W, bias, compute_dtype=jnp.bfloat16):
    """Precompute (once, outside the per-call forward) the block-diagonal
    scorer weight matrix and the 2-D bias.

    W:    [N, D]  (W[i] = scorers[i].weight)
    bias: [N]     (bias[i] = scorers[i].bias)
    """
    N, D = W.shape
    # Wsel[n*D + d, m] = W[n, d] * delta(n, m)   (zeros are exact in bf16)
    wsel = (W[:, :, None] * jnp.eye(N, dtype=W.dtype)[:, None, :]).reshape(N * D, N)
    wsel = wsel.astype(compute_dtype)
    bias2d = bias.reshape(1, N).astype(jnp.float32)
    return wsel, bias2d


def _pick_batch_tile(B, ND, itemsize):
    """Batch tile (multiple of 8) from a VMEM byte budget; ensure >=2 grid
    steps when the batch allows it so v7x's two TensorCores both get work."""
    try:
        vmem_bytes = pltpu.get_tpu_info().vmem_capacity_bytes
    except Exception:  # conservative fallback (v7x-sized)
        vmem_bytes = 64 * 1024 * 1024
    # Per-step x slab target ~2-8 MiB; x2 double-buffering still leaves lots
    # of headroom under every generation's scoped VMEM default.
    slab_budget = max(2 * 1024 * 1024, min(8 * 1024 * 1024, vmem_bytes // 16))
    tb = slab_budget // (2 * ND * itemsize)
    tb = max(8, (tb // 8) * 8)
    b8 = ((B + 7) // 8) * 8                      # batch rounded to sublane multiple
    if b8 >= 16:
        tb = min(tb, max(8, ((b8 // 2) // 8) * 8))   # force grid >= 2
    tb = min(tb, b8)
    return tb


def scorers_w_id_forward(embeddings, mask, wsel, bias2d,
                         compute_dtype=jnp.bfloat16):
    """embeddings: [B, N, D]; mask: [B, N]; wsel/bias2d from make_scorer_params."""
    B, N, D = embeddings.shape
    ND = N * D
    assert wsel.shape == (ND, N) and bias2d.shape == (1, N)

    x_item = jnp.dtype(compute_dtype).itemsize
    TB = _pick_batch_tile(B, ND, x_item)
    Bp = ((B + TB - 1) // TB) * TB
    pad = Bp - B
    num_tiles = Bp // TB

    if pad:
        embeddings = jnp.pad(embeddings, ((0, pad), (0, 0), (0, 0)))
        # pad mask with ones so padded rows don't divide by zero
        mask = jnp.pad(mask, ((0, pad), (0, 0)), constant_values=1.0)

    # Lane-dense bf16 input slab: last dim N*D.
    x_flat = embeddings.reshape(Bp, ND).astype(compute_dtype)
    mask_f32 = mask.astype(jnp.float32)

    w_item = jnp.dtype(wsel.dtype).itemsize
    cost = pl.CostEstimate(
        flops=2 * Bp * ND * N + 4 * Bp * N,
        transcendentals=Bp * N,
        bytes_accessed=(Bp * ND * x_item + ND * N * w_item
                        + Bp * N * 4 + Bp * 4),
    )

    # Only raise the scoped-VMEM limit if the resident + double-buffered tiles
    # actually need it (never at these budgets for small/medium N).
    est_vmem = (2 * TB * ND * x_item + 2 * ND * N * w_item
                + 2 * TB * N * 4 + 2 * N * 4 + 2 * TB * 4)
    cp_kwargs = dict(dimension_semantics=("parallel",))
    if est_vmem > 30 * 1024 * 1024:
        cp_kwargs["vmem_limit_bytes"] = min(48 * 1024 * 1024, int(est_vmem * 1.25))

    out = pl.pallas_call(
        _scorers_kernel,
        out_shape=jax.ShapeDtypeStruct((Bp, 1), jnp.float32),
        grid_spec=pltpu.PrefetchScalarGridSpec(
            num_scalar_prefetch=0,
            grid=(num_tiles,),
            in_specs=[
                pl.BlockSpec((TB, ND), lambda i: (i, 0)),   # embeddings tile
                pl.BlockSpec((ND, N), lambda i: (0, 0)),    # Wsel (resident)
                pl.BlockSpec((1, N), lambda i: (0, 0)),     # bias (resident)
                pl.BlockSpec((TB, N), lambda i: (i, 0)),    # mask tile
            ],
            out_specs=pl.BlockSpec((TB, 1), lambda i: (i, 0)),
        ),
        compiler_params=pltpu.CompilerParams(**cp_kwargs),
        cost_estimate=cost,
    )(x_flat, wsel, bias2d, mask_f32)

    return out[:B, 0]


def _reference(embeddings, mask, W, bias):
    scores = jnp.einsum("bnd,nd->bn", embeddings, W) + bias
    prob = jax.nn.sigmoid(scores) * mask
    return prob.sum(axis=-1) / mask.sum(axis=-1)


if __name__ == "__main__":
    key = jax.random.PRNGKey(0)
    B, N, D = 2, 8, 32          # batch, num_node, em_dim

    k1, k2, k3 = jax.random.split(key, 3)
    embeddings = jax.random.normal(k1, (B, N, D), dtype=jnp.float32)
    # per-node Linear(em_dim, 1) parameters, stacked: W[i] = scorers[i].weight
    W = jax.random.normal(k2, (N, D), dtype=jnp.float32) * 0.1
    bias = jax.random.normal(k3, (N,), dtype=jnp.float32) * 0.1

    # deterministic mask with a couple of zeros (every row keeps >= 1 node)
    mask = jnp.ones((B, N), dtype=jnp.float32)
    mask = mask.at[0, 3].set(0.0).at[1, 6].set(0.0)

    # Precompute the block-diagonal scorer weights once (not per forward call).
    wsel, bias2d = make_scorer_params(W, bias, compute_dtype=jnp.bfloat16)

    out = scorers_w_id_forward(embeddings, mask, wsel, bias2d)
    out = jax.block_until_ready(out)

    ref = _reference(embeddings, mask, W, bias)
    assert out.shape == (B,)
    # bf16 MXU operands + approx reciprocal -> loosened tolerance vs f32 ref
    assert jnp.allclose(out, ref, atol=2e-2, rtol=2e-2), "mismatch vs reference"

    print("KERNEL_OK")
</pallas_src>

<mosaic_0001>
module attributes {stable_mosaic.version = 11 : i64} {
  func.func @_scorers_kernel(%arg0: i32, %arg1: memref<8x256xbf16, #tpu.memory_space<vmem>>, %arg2: memref<256x8xbf16, #tpu.memory_space<vmem>>, %arg3: memref<1x8xf32, #tpu.memory_space<vmem>>, %arg4: memref<8x8xf32, #tpu.memory_space<vmem>>, %arg5: memref<8x1xf32, #tpu.memory_space<vmem>>) attributes {dimension_semantics = [#tpu.dimension_semantics<parallel>], iteration_bounds = array<i64: 1>, scalar_prefetch = 0 : i64, scratch_operands = 0 : i64, tpu.core_type = #tpu.core_type<tc>, window_params = [{transform_indices = @transform_0, window_bounds = array<i64: 8, 256>}, {pipeline_mode = #tpu.pipeline_mode<synchronous>, transform_indices = @transform_1, window_bounds = array<i64: 256, 8>}, {pipeline_mode = #tpu.pipeline_mode<synchronous>, transform_indices = @transform_2, window_bounds = array<i64: 1, 8>}, {transform_indices = @transform_3, window_bounds = array<i64: 8, 8>}, {transform_indices = @transform_4, window_bounds = array<i64: 8, 1>}]} {
    %c0 = arith.constant 0 : index
    %c0_0 = arith.constant 0 : index
    %0 = vector.load %arg1[%c0, %c0_0] : memref<8x256xbf16, #tpu.memory_space<vmem>>, vector<8x256xbf16>
    %c0_1 = arith.constant 0 : index
    %c0_2 = arith.constant 0 : index
    %1 = vector.load %arg2[%c0_1, %c0_2] : memref<256x8xbf16, #tpu.memory_space<vmem>>, vector<256x8xbf16>
    %cst = arith.constant dense<0.000000e+00> : vector<8x8xf32>
    %2 = tpu.matmul %0, %1, %cst {dimension_numbers = #tpu.dot_dimension_numbers<[1], [0], [0], [1], [0, 0, 1, 1], [], []>} : vector<8x256xbf16>, vector<256x8xbf16>, vector<8x8xf32> -> vector<8x8xf32>
    %c0_3 = arith.constant 0 : index
    %c0_4 = arith.constant 0 : index
    %3 = vector.load %arg3[%c0_3, %c0_4] : memref<1x8xf32, #tpu.memory_space<vmem>>, vector<1x8xf32>
    %4 = vector.broadcast %3 : vector<1x8xf32> to vector<8x8xf32>
    %5 = arith.addf %2, %4 : vector<8x8xf32>
    %6 = arith.negf %5 : vector<8x8xf32>
    %7 = math.exp %6 : vector<8x8xf32>
    %cst_5 = arith.constant 1.000000e+00 : f32
    %8 = vector.broadcast %cst_5 : f32 to vector<8x8xf32>
    %9 = arith.addf %8, %7 : vector<8x8xf32>
    %10 = arith.divf %8, %9 : vector<8x8xf32>
    %c0_6 = arith.constant 0 : index
    %c0_7 = arith.constant 0 : index
    %11 = vector.load %arg4[%c0_6, %c0_7] : memref<8x8xf32, #tpu.memory_space<vmem>>, vector<8x8xf32>
    %12 = arith.mulf %10, %11 : vector<8x8xf32>
    %cst_8 = arith.constant dense<0.000000e+00> : vector<8xf32>
    %13 = vector.multi_reduction <add>, %12, %cst_8 [1] : vector<8x8xf32> to vector<8xf32>
    %14 = vector.shape_cast %13 : vector<8xf32> to vector<8x1xf32>
    %cst_9 = arith.constant dense<0.000000e+00> : vector<8xf32>
    %15 = vector.multi_reduction <add>, %11, %cst_9 [1] : vector<8x8xf32> to vector<8xf32>
    %16 = vector.shape_cast %15 : vector<8xf32> to vector<8x1xf32>
    %17 = tpu.reciprocal %16 {approx = true} : vector<8x1xf32> -> vector<8x1xf32>
    %18 = arith.mulf %14, %17 : vector<8x1xf32>
    %c0_10 = arith.constant 0 : index
    %c0_11 = arith.constant 0 : index
    %19 = vector.load %arg5[%c0_10, %c0_11] : memref<8x1xf32, #tpu.memory_space<vmem>>, vector<8x1xf32>
    tpu.vector_store %arg5[%c0_10, %c0_11], %18 {strides = array<i32>} : memref<8x1xf32, #tpu.memory_space<vmem>>, vector<8x1xf32>,
    return
  }
  func.func @transform_0(%arg0: i32) -> (i32, i32) {
    %c0_i32 = arith.constant 0 : i32
    %c0_i32_0 = arith.constant 0 : i32
    return %arg0, %c0_i32 : i32, i32
  }
  func.func @transform_1(%arg0: i32) -> (i32, i32) {
    %c0_i32 = arith.constant 0 : i32
    %c0_i32_0 = arith.constant 0 : i32
    %c0_i32_1 = arith.constant 0 : i32
    return %c0_i32, %c0_i32_0 : i32, i32
  }
  func.func @transform_2(%arg0: i32) -> (i32, i32) {
    %c0_i32 = arith.constant 0 : i32
    %c0_i32_0 = arith.constant 0 : i32
    %c0_i32_1 = arith.constant 0 : i32
    return %c0_i32, %c0_i32_0 : i32, i32
  }
  func.func @transform_3(%arg0: i32) -> (i32, i32) {
    %c0_i32 = arith.constant 0 : i32
    %c0_i32_0 = arith.constant 0 : i32
    return %arg0, %c0_i32 : i32, i32
  }
  func.func @transform_4(%arg0: i32) -> (i32, i32) {
    %c0_i32 = arith.constant 0 : i32
    %c0_i32_0 = arith.constant 0 : i32
    return %arg0, %c0_i32 : i32, i32
  }
}

</mosaic_0001>

<bundles_post_ra>
// kernel: tpu_custom_call.1
= control target key start
LH: loop header
LB: loop body
LE: loop exit
PB: predicated region body
PF: predicated region fallthrough
CT: control target
= control target key end

     0   :  { %vm209_vm0 = vcmask 64512   ;;  %vm218_vm1 = vcmask 7168   ;;  %s377_s1 = inlined_call_operand.vmem [shape: bf16[256,8], index: 1, kind: input, shape index: {}]   ;;  %s378_s0 = inlined_call_operand.vmem [shape: bf16[8,256], index: 0, kind: input, shape index: {}]   ;;  %s379_s3 = inlined_call_operand.vmem [shape: f32[8,8], index: 3, kind: input, shape index: {}]   ;;  %s380_s2 = inlined_call_operand.vmem [shape: f32[1,8], index: 2, kind: input, shape index: {}]   ;;  %s381_s4 = inlined_call_operand.vmem [shape: f32[8,1], index: 4, kind: output, shape index: {}]  }
   0x1   :  { %v266_v0 = vld [vmem:[%s377_s1 + $0x40] sm:$0xff]   ;;  %v268_v2 = vld [vmem:[%s377_s1 + $0x48] sm:$0xff]   ;;  %v270_v4 = vld [vmem:[%s377_s1 + $0x50] sm:$0xff]  }
   0x2   :  { %v267_v1 = vld [vmem:[%s377_s1] sm:$0xff]   ;;  %244 = vmatprep.subr.bf16.mxu0 %v266_v0  ;;  %v269_v3 = vld [vmem:[%s377_s1 + $0x8] sm:$0xff]   ;;  %v271_v5 = vld [vmem:[%s377_s1 + $0x10] sm:$0xff]  }
   0x3   :  { %245 = vmatpush3.bf16.msra.mxu0 %v267_v1  ;;  %v272_v6 = vld [vmem:[%s377_s1 + $0x58] sm:$0xff]   ;;  %v274_v8 = vld [vmem:[%s377_s1 + $0x60] sm:$0xff]   ;;  %v276_v10 = vld [vmem:[%s377_s1 + $0x68] sm:$0xff]  }
   0x4   :  { %246 = vmatprep.subr.bf16.mxu0 %v268_v2  ;;  %v273_v7 = vld [vmem:[%s377_s1 + $0x18] sm:$0xff]   ;;  %v275_v9 = vld [vmem:[%s377_s1 + $0x20] sm:$0xff]   ;;  %v277_v13 = vld [vmem:[%s377_s1 + $0x28] sm:$0xff]  }
   0x5   :  { %v18_v11 = vld [vmem:[%s378_s0] sm:$0xff]  ;;  %v278_v14 = vld [vmem:[%s377_s1 + $0x70] sm:$0xff]   ;;  %v280_v16 = vld [vmem:[%s377_s1 + $0x78] sm:$0xff]  }
   0x6   :  { %v226_v12 = vcombine.high %v18_v11, %v18_v11  ;;  %v279_v15 = vld [vmem:[%s377_s1 + $0x30] sm:$0xff]   ;;  %v281_v17 = vld [vmem:[%s377_s1 + $0x38] sm:$0xff]   ;;  %v225_v18 = vcombine.low %v18_v11, %v18_v11  ;;  %v207_v19 = vld [vmem:[%s379_s3] sm:$0xff] }
   0x7   :  { %247 = vmatpush3.bf16.msra.mxu0 %v269_v3  ;;  %v213_v20 = vsel %vm209_vm0, %v207_v19, 0.0  ;;  %v224_v22 = vld [vmem:[%s380_s2] ss:$0 sm:$0xff] }
   0x8   :  { %248 = vmatprep.subr.bf16.mxu0 %v270_v4  ;;  %193 = vmatprep.mubr.bf16.mxu0 %v226_v12 }
   0x9   :  { %214 = vadd.xlane.f32.xlu0 %v213_v20 }
   0xb   :  { %249 = vmatpush3.bf16.msra.mxu0 %v271_v5 }
   0xc   :  { %250 = vmatprep.subr.bf16.mxu0 %v272_v6 }
   0xf   :  { %251 = vmatpush3.bf16.msra.mxu0 %v273_v7 }
  0x10   :  { %252 = vmatprep.subr.bf16.mxu0 %v274_v8 }
  0x13   :  { %253 = vmatpush3.bf16.msra.mxu0 %v275_v9 }
  0x14   :  { %254 = vmatprep.subr.bf16.mxu0 %v276_v10 }
  0x17   :  { %255 = vmatpush3.bf16.msra.mxu0 %v277_v13 }
  0x18   :  { %256 = vmatprep.subr.bf16.mxu0 %v278_v14 }
  0x1b   :  { %257 = vmatpush3.bf16.msra.mxu0 %v279_v15 }
  0x1c   :  { %258 = vmatprep.subr.bf16.mxu0 %v280_v16 }
  0x1f   :  { %259 = vmatpush3.bf16.msra.mxu0 %v281_v17 }
  0x22   :  { %194 = vmatmul.mubr.bf16.vlgmr.msra.gmra.mrb[0].mxu0 %v225_v18 }
  0x96   :  { %v215_v34 = vpop.xlane.xlu0 %214 }
  0xf5   :  { %v260_v21 = vpop.f32.mrb[0].mxu0 }
  0xf6   :  { %v261_v23 = vpop.f32.mrb[1].mxu0 }
  0xf7   :  { %v262_v24 = vadd.f32 %v261_v23, %v260_v21  ;;  %v263_v25 = vpop.f32.mrb[2].mxu0 }
  0xf8   :  { %v264_v26 = vpop.f32.mrb[3].mxu0 }
  0xf9   :  { %v196_v27 = vadd.f32 %v262_v24, %v224_v22 }
  0xfb   :  { %v243_v28 = vmul.f32 -1.442695, %v196_v27 }
  0xfd   :  { %284 = vpow2.f32 %v243_v28 }
 0x107   :  { %v285_v29 = vpop.eup %284 }
 0x108   :  { %v204_v30 = vadd.f32 1.0, %v285_v29 }
 0x10a   :  { %286 = vrcp.f32 %v204_v30 }
 0x10b   :  { %288 = vrcp.f32 %v215_v34 }
 0x114   :  { %v287_v31 = vpop.eup %286 }
 0x115   :  { %v208_v32 = vmul.f32 %v287_v31, %v207_v19  ;;  %v289_v35 = vpop.eup %288 }
 0x117   :  { %v210_v33 = vsel %vm209_vm0, %v208_v32, 0.0 }
 0x118   :  { %211 = vadd.xlane.f32.xlu0 %v210_v33 }
 0x1a5   :  { %v212_v36 = vpop.xlane.xlu0 %211 }
 0x1a6   :  { %v217_v37 = vmul.f32 %v289_v35, %v212_v36 }
 0x1a8   :  { %219 = vst.msk [vmem:[%s381_s4] sm:$0xff] %vm218_vm1, %v217_v37 }

</bundles_post_ra>
